<compile_context>
chip_gen: v7x
topology: tpu7x:2x2x1
jax: 0.10.0
libtpu: 0.0.40
codegen_flags: <defaults>
</compile_context>

<pallas_src>
import jax
import jax.numpy as jnp
from jax.experimental import pallas as pl
from jax.experimental.pallas import tpu as pltpu


def contrastive_rpnet_kernel(x1_ref, x2_ref, w_ref, b_emb_ref, w_clf_ref,
                             b_clf_ref, out_ref):
    # Embedding Linear + ReLU for both views.  Weights stay MXU-resident
    # across the two pushes (and across grid steps); accumulation in f32.
    z1 = jnp.dot(x1_ref[...], w_ref[...], preferred_element_type=jnp.float32)
    z2 = jnp.dot(x2_ref[...], w_ref[...], preferred_element_type=jnp.float32)
    b = b_emb_ref[...]                                    # (1, E) f32
    z1 = jnp.maximum(z1 + b, 0.0)
    z2 = jnp.maximum(z2 + b, 0.0)

    d = jnp.abs(z1 - z2)                                  # (tm, E) f32

    # TODO(synk): Dropout(p) is identity in eval mode; train-mode masking not emitted.
    # Classifier Linear(E, 1): VPU multiply + lane (XLU) reduce, no N=1 matmul.
    logits = jnp.sum(d * w_clf_ref[...], axis=-1, keepdims=True)   # (tm, 1)
    out_ref[...] = (logits + b_clf_ref[0, 0]).astype(out_ref.dtype)


def _round_up(x, m):
    return ((x + m - 1) // m) * m


def contrastive_rpnet(x1, x2, w_emb_t, b_emb, w_clf, b_clf, *, tm=4096):
    """Forward pass of ContrastiveRPNet.

    Args:
      x1, x2  : (B, D_in) input views (float32 or bf16-at-rest).
      w_emb_t : (E, D_in) embedding weight (torch nn.Linear (out, in) layout).
      b_emb   : (E,)      embedding bias.
      w_clf   : (1, E)    classifier weight (torch layout).
      b_clf   : (1,)      classifier bias.
      tm      : batch tile (sublane rows) per grid step; multiple of 8.
                On v7x keep tm <= B/2 so both TensorCores get a tile.
    Returns:
      (B, 1) float32 logits.
    """
    assert tm % 8 == 0
    B, D = x1.shape
    E = w_emb_t.shape[0]

    # Batch tile on the sublane axis: multiple of 8, no larger than needed.
    tm_eff = max(8, min(tm, _round_up(B, 8)))
    nt = pl.cdiv(B, tm_eff)
    Bp = nt * tm_eff

    # Pad only the final tile (nothing at all when tm_eff divides B).
    if Bp != B:
        pad = ((0, Bp - B), (0, 0))
        x1 = jnp.pad(x1, pad)
        x2 = jnp.pad(x2, pad)

    in_dtype = x1.dtype
    # Tiny one-off weight prep: (D, E) layout, matched to the x stream dtype.
    w = jnp.asarray(w_emb_t).T.astype(in_dtype)           # (D, E)
    b_emb_row = jnp.asarray(b_emb, jnp.float32).reshape(1, E)
    w_clf_row = jnp.asarray(w_clf, jnp.float32).reshape(1, E)
    b_clf_s = jnp.asarray(b_clf, jnp.float32).reshape(1, 1)

    itemsize = jnp.dtype(in_dtype).itemsize
    flops = 2 * (2 * Bp * D * E) + 6 * Bp * E             # two matmuls + elementwise
    bytes_accessed = (2 * Bp * D * itemsize               # x1 + x2 stream
                      + D * E * itemsize + 2 * E * 4 + 4  # weights / biases
                      + Bp * 4)                           # output

    out = pl.pallas_call(
        contrastive_rpnet_kernel,
        out_shape=jax.ShapeDtypeStruct((Bp, 1), jnp.float32),
        grid_spec=pltpu.PrefetchScalarGridSpec(
            num_scalar_prefetch=0,
            grid=(nt,),
            in_specs=[
                pl.BlockSpec((tm_eff, D), lambda i: (i, 0)),   # x1 tile
                pl.BlockSpec((tm_eff, D), lambda i: (i, 0)),   # x2 tile
                pl.BlockSpec((D, E), lambda i: (0, 0)),        # emb weight (resident)
                pl.BlockSpec((1, E), lambda i: (0, 0)),        # emb bias
                pl.BlockSpec((1, E), lambda i: (0, 0)),        # clf weight
                pl.BlockSpec(memory_space=pltpu.MemorySpace.SMEM),  # clf bias scalar
            ],
            out_specs=pl.BlockSpec((tm_eff, 1), lambda i: (i, 0)),
        ),
        compiler_params=pltpu.CompilerParams(
            dimension_semantics=("parallel",)),
        cost_estimate=pl.CostEstimate(
            flops=flops, transcendentals=0, bytes_accessed=bytes_accessed),
    )(x1, x2, w, b_emb_row, w_clf_row, b_clf_s)

    return out[:B]


def reference(x1, x2, w_emb_t, b_emb, w_clf, b_clf):
    z1 = jnp.maximum(x1 @ w_emb_t.T + b_emb, 0.0)
    z2 = jnp.maximum(x2 @ w_emb_t.T + b_emb, 0.0)
    return jnp.abs(z1 - z2) @ w_clf.T + b_clf


if __name__ == "__main__":
    # Small, module-consistent shapes: batch=8, input dim=32, emb_size=32.
    B, D_IN, EMB = 8, 32, 32

    key = jax.random.PRNGKey(0)
    k1, k2, k3, k4, k5, k6, k7, k8 = jax.random.split(key, 8)

    x1 = jax.random.normal(k1, (B, D_IN), dtype=jnp.float32)
    x2 = jax.random.normal(k2, (B, D_IN), dtype=jnp.float32)

    # torch.nn.Linear-style init: uniform(-1/sqrt(fan_in), 1/sqrt(fan_in)).
    lim_emb = 1.0 / jnp.sqrt(jnp.float32(D_IN))
    w_emb_t = jax.random.uniform(k3, (EMB, D_IN), minval=-lim_emb, maxval=lim_emb,
                                 dtype=jnp.float32)       # (out, in) layout
    b_emb = jax.random.uniform(k4, (EMB,), minval=-lim_emb, maxval=lim_emb,
                               dtype=jnp.float32)

    lim_clf = 1.0 / jnp.sqrt(jnp.float32(EMB))
    w_clf = jax.random.uniform(k5, (1, EMB), minval=-lim_clf, maxval=lim_clf,
                               dtype=jnp.float32)
    b_clf = jax.random.uniform(k6, (1,), minval=-lim_clf, maxval=lim_clf,
                               dtype=jnp.float32)

    # --- f32 path, single tile (strict check) ---
    ref = reference(x1, x2, w_emb_t, b_emb, w_clf, b_clf)
    out = contrastive_rpnet(x1, x2, w_emb_t, b_emb, w_clf, b_clf)
    out = jax.block_until_ready(out)
    assert out.shape == (B, 1), out.shape
    assert jnp.allclose(out, ref, atol=1e-4, rtol=1e-4), (out, ref)

    # --- multi-tile grid + padded tail path ---
    B2 = 300
    x1b = jax.random.normal(k7, (B2, D_IN), dtype=jnp.float32)
    x2b = jax.random.normal(k8, (B2, D_IN), dtype=jnp.float32)
    ref2 = reference(x1b, x2b, w_emb_t, b_emb, w_clf, b_clf)
    out2 = contrastive_rpnet(x1b, x2b, w_emb_t, b_emb, w_clf, b_clf, tm=128)
    out2 = jax.block_until_ready(out2)
    assert out2.shape == (B2, 1), out2.shape
    assert jnp.allclose(out2, ref2, atol=1e-4, rtol=1e-4)

    # --- bf16-at-rest streaming path (x stored bf16; f32 accum/elementwise) ---
    out_bf16 = contrastive_rpnet(x1.astype(jnp.bfloat16), x2.astype(jnp.bfloat16),
                                 w_emb_t, b_emb, w_clf, b_clf)
    out_bf16 = jax.block_until_ready(out_bf16)
    assert jnp.allclose(out_bf16, ref, atol=5e-2, rtol=5e-2), (out_bf16, ref)

    print("KERNEL_OK")
</pallas_src>

<mosaic_0001>
module attributes {stable_mosaic.version = 11 : i64} {
  func.func @contrastive_rpnet_kernel(%arg0: i32, %arg1: memref<8x32xf32, #tpu.memory_space<vmem>>, %arg2: memref<8x32xf32, #tpu.memory_space<vmem>>, %arg3: memref<32x32xf32, #tpu.memory_space<vmem>>, %arg4: memref<1x32xf32, #tpu.memory_space<vmem>>, %arg5: memref<1x32xf32, #tpu.memory_space<vmem>>, %arg6: memref<1x1xf32, #tpu.memory_space<smem>>, %arg7: memref<8x1xf32, #tpu.memory_space<vmem>>) attributes {dimension_semantics = [#tpu.dimension_semantics<parallel>], iteration_bounds = array<i64: 1>, scalar_prefetch = 0 : i64, scratch_operands = 0 : i64, tpu.core_type = #tpu.core_type<tc>, window_params = [{transform_indices = @transform_0, window_bounds = array<i64: 8, 32>}, {transform_indices = @transform_1, window_bounds = array<i64: 8, 32>}, {pipeline_mode = #tpu.pipeline_mode<synchronous>, transform_indices = @transform_2, window_bounds = array<i64: 32, 32>}, {pipeline_mode = #tpu.pipeline_mode<synchronous>, transform_indices = @transform_3, window_bounds = array<i64: 1, 32>}, {pipeline_mode = #tpu.pipeline_mode<synchronous>, transform_indices = @transform_4, window_bounds = array<i64: 1, 32>}, {transform_indices = @transform_5, window_bounds = array<i64: 1, 1>}, {transform_indices = @transform_6, window_bounds = array<i64: 8, 1>}]} {
    %c0 = arith.constant 0 : index
    %c0_0 = arith.constant 0 : index
    %0 = vector.load %arg1[%c0, %c0_0] : memref<8x32xf32, #tpu.memory_space<vmem>>, vector<8x32xf32>
    %c0_1 = arith.constant 0 : index
    %c0_2 = arith.constant 0 : index
    %1 = vector.load %arg3[%c0_1, %c0_2] : memref<32x32xf32, #tpu.memory_space<vmem>>, vector<32x32xf32>
    %cst = arith.constant dense<0.000000e+00> : vector<8x32xf32>
    %2 = tpu.matmul %0, %1, %cst {dimension_numbers = #tpu.dot_dimension_numbers<[1], [0], [0], [1], [0, 0, 1, 1], [], []>} : vector<8x32xf32>, vector<32x32xf32>, vector<8x32xf32> -> vector<8x32xf32>
    %c0_3 = arith.constant 0 : index
    %c0_4 = arith.constant 0 : index
    %3 = vector.load %arg2[%c0_3, %c0_4] : memref<8x32xf32, #tpu.memory_space<vmem>>, vector<8x32xf32>
    %c0_5 = arith.constant 0 : index
    %c0_6 = arith.constant 0 : index
    %4 = vector.load %arg3[%c0_5, %c0_6] : memref<32x32xf32, #tpu.memory_space<vmem>>, vector<32x32xf32>
    %cst_7 = arith.constant dense<0.000000e+00> : vector<8x32xf32>
    %5 = tpu.matmul %3, %4, %cst_7 {dimension_numbers = #tpu.dot_dimension_numbers<[1], [0], [0], [1], [0, 0, 1, 1], [], []>} : vector<8x32xf32>, vector<32x32xf32>, vector<8x32xf32> -> vector<8x32xf32>
    %c0_8 = arith.constant 0 : index
    %c0_9 = arith.constant 0 : index
    %6 = vector.load %arg4[%c0_8, %c0_9] : memref<1x32xf32, #tpu.memory_space<vmem>>, vector<1x32xf32>
    %7 = vector.broadcast %6 : vector<1x32xf32> to vector<8x32xf32>
    %8 = arith.addf %2, %7 : vector<8x32xf32>
    %cst_10 = arith.constant 0.000000e+00 : f32
    %9 = vector.broadcast %cst_10 : f32 to vector<8x32xf32>
    %10 = arith.maximumf %8, %9 : vector<8x32xf32>
    %11 = vector.broadcast %6 : vector<1x32xf32> to vector<8x32xf32>
    %12 = arith.addf %5, %11 : vector<8x32xf32>
    %cst_11 = arith.constant 0.000000e+00 : f32
    %13 = vector.broadcast %cst_11 : f32 to vector<8x32xf32>
    %14 = arith.maximumf %12, %13 : vector<8x32xf32>
    %15 = arith.subf %10, %14 : vector<8x32xf32>
    %16 = math.absf %15 : vector<8x32xf32>
    %c0_12 = arith.constant 0 : index
    %c0_13 = arith.constant 0 : index
    %17 = vector.load %arg5[%c0_12, %c0_13] : memref<1x32xf32, #tpu.memory_space<vmem>>, vector<1x32xf32>
    %18 = vector.broadcast %17 : vector<1x32xf32> to vector<8x32xf32>
    %19 = arith.mulf %16, %18 : vector<8x32xf32>
    %cst_14 = arith.constant dense<0.000000e+00> : vector<8xf32>
    %20 = vector.multi_reduction <add>, %19, %cst_14 [1] : vector<8x32xf32> to vector<8xf32>
    %21 = vector.shape_cast %20 : vector<8xf32> to vector<8x1xf32>
    %c0_15 = arith.constant 0 : index
    %c0_16 = arith.constant 0 : index
    %22 = memref.load %arg6[%c0_15, %c0_16] : memref<1x1xf32, #tpu.memory_space<smem>>
    %23 = vector.broadcast %22 : f32 to vector<8x1xf32>
    %24 = arith.addf %21, %23 : vector<8x1xf32>
    %c0_17 = arith.constant 0 : index
    %c0_18 = arith.constant 0 : index
    %25 = vector.load %arg7[%c0_17, %c0_18] : memref<8x1xf32, #tpu.memory_space<vmem>>, vector<8x1xf32>
    tpu.vector_store %arg7[%c0_17, %c0_18], %24 {strides = array<i32>} : memref<8x1xf32, #tpu.memory_space<vmem>>, vector<8x1xf32>,
    return
  }
  func.func @transform_0(%arg0: i32) -> (i32, i32) {
    %c0_i32 = arith.constant 0 : i32
    %c0_i32_0 = arith.constant 0 : i32
    return %arg0, %c0_i32 : i32, i32
  }
  func.func @transform_1(%arg0: i32) -> (i32, i32) {
    %c0_i32 = arith.constant 0 : i32
    %c0_i32_0 = arith.constant 0 : i32
    return %arg0, %c0_i32 : i32, i32
  }
  func.func @transform_2(%arg0: i32) -> (i32, i32) {
    %c0_i32 = arith.constant 0 : i32
    %c0_i32_0 = arith.constant 0 : i32
    %c0_i32_1 = arith.constant 0 : i32
    return %c0_i32, %c0_i32_0 : i32, i32
  }
  func.func @transform_3(%arg0: i32) -> (i32, i32) {
    %c0_i32 = arith.constant 0 : i32
    %c0_i32_0 = arith.constant 0 : i32
    %c0_i32_1 = arith.constant 0 : i32
    return %c0_i32, %c0_i32_0 : i32, i32
  }
  func.func @transform_4(%arg0: i32) -> (i32, i32) {
    %c0_i32 = arith.constant 0 : i32
    %c0_i32_0 = arith.constant 0 : i32
    %c0_i32_1 = arith.constant 0 : i32
    return %c0_i32, %c0_i32_0 : i32, i32
  }
  func.func @transform_5(%arg0: i32) -> (i32, i32) {
    %c0_i32 = arith.constant 0 : i32
    %c0_i32_0 = arith.constant 0 : i32
    %c0_i32_1 = arith.constant 0 : i32
    return %c0_i32, %c0_i32_0 : i32, i32
  }
  func.func @transform_6(%arg0: i32) -> (i32, i32) {
    %c0_i32 = arith.constant 0 : i32
    %c0_i32_0 = arith.constant 0 : i32
    return %arg0, %c0_i32 : i32, i32
  }
}

</mosaic_0001>

<bundles_post_ra>
// kernel: tpu_custom_call.1
= control target key start
LH: loop header
LB: loop body
LE: loop exit
PB: predicated region body
PF: predicated region fallthrough
CT: control target
= control target key end

     0   :  { %12 = vsyncpa [#allocation4], 0  ;;  %s467_s0 = inlined_call_operand.hbm [shape: f32[8,32], index: 0, kind: input, shape index: {}]   ;;  %s468_s1 = inlined_call_operand.hbm [shape: f32[8,32], index: 1, kind: input, shape index: {}]   ;;  %s469_s2 = inlined_call_operand.hbm [shape: f32[32,32], index: 2, kind: input, shape index: {}]   ;;  %s470_s3 = inlined_call_operand.vmem [shape: f32[1,32], index: 3, kind: input, shape index: {}]   ;;  %s471_s4 = inlined_call_operand.vmem [shape: f32[1,32], index: 4, kind: input, shape index: {}]   ;;  %s472_s5 = inlined_call_operand.<no memory space> [shape: f32[1,1], index: 5, kind: input, shape index: {}]   ;;  %s473_s6 = inlined_call_operand.vmem [shape: f32[8,1], index: 6, kind: output, shape index: {}]  }
   0x1   :  { %13 = vsyncpa [#allocation6], 0  ;;  %s373_s21 = smov [#allocation5]   ;;  %s374_s23 = smov [#allocation3]  }
   0x2   :  { %s30_s22 = sshll.u32 %s373_s21, 4  ;;  %s20_s24 = sshll.u32 %s374_s23, 4  ;;  %s31_s22 = int_to_ptr.vmem [resolvable:$true] %s30_s22  ;;  %s21_s24 = int_to_ptr.vmem [resolvable:$true] %s20_s24 }
   0x3   :  { %s303_s27 = scalar_lea.hbm %s468_s1, 128 }
   0x4   :  { %p304_p0 = scmp.ne.s32.totalorder %s468_s1, %s303_s27  ;;  %p307_p1 = scmp.lt.u32.totalorder %s303_s27, %s468_s1 }
   0x6   :  { %p309_p2 = pnand %p307_p1, %p304_p0 }
   0x8   :  { %312 = shalt.err (!%p309_p2)
}
   0x9   :  { %s313_s8 = scalar_lea.vmem %s31_s22, 128  ;;  %p318_p4 = scmp.lt.s32.totalorder %s31_s22, %s31_s22 }
   0xa   :  { %p314_p3 = scmp.ne.s32.totalorder %s31_s22, %s313_s8  ;;  %p319_p5 = scmp.lt.s32.totalorder %s313_s8, %s313_s8 }
   0xc   :  { %p320_p6 = por %p319_p5, %p318_p4 }
   0xe   :  { %p321_p7 = pnand %p320_p6, %p314_p3 }
  0x10   :  { %324 = shalt.err (!%p321_p7)
}
  0x11   :  { %33 = dma.hbm_to_vmem [thread:$0]  %s468_s1, 128, %s31_s22, [#allocation6]  }
  0x12   :  { %s325_s13 = scalar_lea.hbm %s467_s0, 128 }
  0x13   :  { %p326_p8 = scmp.ne.s32.totalorder %s467_s0, %s325_s13  ;;  %p329_p9 = scmp.lt.u32.totalorder %s325_s13, %s467_s0 }
  0x15   :  { %p331_p10 = pnand %p329_p9, %p326_p8 }
  0x17   :  { %334 = shalt.err (!%p331_p10)
}
  0x18   :  { %s335_s18 = scalar_lea.vmem %s21_s24, 128  ;;  %p340_p12 = scmp.lt.s32.totalorder %s21_s24, %s21_s24 }
  0x19   :  { %p336_p11 = scmp.ne.s32.totalorder %s21_s24, %s335_s18  ;;  %p341_p13 = scmp.lt.s32.totalorder %s335_s18, %s335_s18 }
  0x1b   :  { %p342_p0 = por %p341_p13, %p340_p12 }
  0x1d   :  { %p343_p1 = pnand %p342_p0, %p336_p11 }
  0x1f   :  { %346 = shalt.err (!%p343_p1)
}
  0x20   :  { %23 = dma.hbm_to_vmem [thread:$0]  %s467_s0, 128, %s21_s24, [#allocation4]  }
  0x21   :  { %s375_s20 = smov [#allocation7]   ;;  %s347_s25 = scalar_lea.hbm %s469_s2, 512 }
  0x22   :  { %s39_s21 = sshll.u32 %s375_s20, 4  ;;  %p348_p2 = scmp.ne.s32.totalorder %s469_s2, %s347_s25  ;;  %s40_s21 = int_to_ptr.vmem [resolvable:$true] %s39_s21 }
  0x23   :  { %p351_p3 = scmp.lt.u32.totalorder %s347_s25, %s469_s2 }
  0x25   :  { %p353_p4 = pnand %p351_p3, %p348_p2 }
  0x27   :  { %356 = shalt.err (!%p353_p4)
}
  0x28   :  { %s357_s30 = scalar_lea.vmem %s40_s21, 512  ;;  %p362_p6 = scmp.lt.s32.totalorder %s40_s21, %s40_s21 }
  0x29   :  { %p358_p5 = scmp.ne.s32.totalorder %s40_s21, %s357_s30  ;;  %p363_p7 = scmp.lt.s32.totalorder %s357_s30, %s357_s30 }
  0x2b   :  { %p364_p8 = por %p363_p7, %p362_p6 }
  0x2d   :  { %p365_p9 = pnand %p364_p8, %p358_p5 }
  0x2f   :  { %368 = shalt.err (!%p365_p9)
}
  0x30   :  { %s376_s0 = smov 128   ;;  %s377_s24 = smov 8  }
  0x31   :  { %45 = dma.hbm_to_vmem [thread:$0]  %s469_s2, 512, %s40_s21, [#allocation6], %s376_s0, %s376_s0, %s377_s24  }
  0x32   :  { %369 = dma.done.wait [#allocation4], 128  }
  0x33   :  { %370 = vsyncadd [#allocation4], 4294967168 }
  0x34   :  { %371 = dma.done.wait [#allocation6], 640  }
  0x35   :  { %372 = vsyncadd [#allocation6], 4294966656  ;;  %v378_v0 = vmov 0.0|0.0   ;;  %vm379_vm0 = vmmov 0   ;;  %v380_v1 = vmov 0.0   ;;  %v62_v2 = vld [vmem:[#allocation7] sm:$0xff]  ;;  %v237_v24 = vstv %s472_s5 }
  0x36   :  { %283 = vmatprep.subr.bf16.mxu0 %v378_v0  ;;  %289 = vmatprep.subr.bf16.mxu1 %v378_v0  ;;  %v63_v3 = vld [vmem:[#allocation7 + $0x8] sm:$0xff]  ;;  %v64_v4 = vld [vmem:[#allocation7 + $0x10] sm:$0xff]  ;;  %v65_v6 = vld [vmem:[#allocation7 + $0x18] sm:$0xff]  ;;  %vm74_vm1 = vcmask 261120   ;;  %vm239_vm2 = vcmask 7168  }
  0x37   :  { %269 = vmatprep.mubr.msk.f32.mxu0 %vm379_vm0, %v380_v1  ;;  %280 = vmatprep.mubr.msk.f32.mxu1 %vm379_vm0, %v380_v1  ;;  %v284_v5 = vpack.c.bf16 %v63_v3, %v62_v2  ;;  %v287_v7 = vpack.c.bf16 %v65_v6, %v64_v4  ;;  %v61_v8 = vld [vmem:[#allocation3] sm:$0xff]  ;;  %v66_v9 = vld [vmem:[#allocation5] sm:$0xff] }
  0x38   :  { %v247_v10 = vld [vmem:[%s470_s3] ss:$0 sm:$0xff] }
  0x39   :  { %285 = vmatpush3.bf16.msra.mxu0 %v284_v5  ;;  %291 = vmatpush3.bf16.msra.mxu1 %v284_v5  ;;  %v250_v20 = vld [vmem:[%s471_s4] ss:$0 sm:$0xff] }
  0x3a   :  { %286 = vmatprep.subr.bf16.mxu0 %v378_v0  ;;  %292 = vmatprep.subr.bf16.mxu1 %v378_v0 }
  0x3d   :  { %288 = vmatpush3.bf16.msra.mxu0 %v287_v7  ;;  %294 = vmatpush3.bf16.msra.mxu1 %v287_v7 }
  0x40   :  { %270 = vmatmul.mubr.msk.f32.vlgmr.msra.gmra.mrb[0].mxu0 %vm74_vm1, %v61_v8  ;;  %281 = vmatmul.mubr.msk.f32.vlgmr.msra.gmra.mrb[0].mxu1 %vm74_vm1, %v66_v9 }
 0x113   :  { %v144_v11 = vpop.f32.mrb[0].mxu0  ;;  %v218_v12 = vpop.f32.mrb[0].mxu1 }
 0x114   :  { %v145_v13 = vadd.f32 %v247_v10, %v144_v11  ;;  %v219_v14 = vadd.f32 %v247_v10, %v218_v12  ;;  %v271_v15 = vpop.f32.mrb[1].mxu0  ;;  %v282_v16 = vpop.f32.mrb[1].mxu1 }
 0x116   :  { %v148_v17 = vmax.f32 %v145_v13, 0.0  ;;  %v222_v18 = vmax.f32 %v219_v14, 0.0 }
 0x118   :  { %v223_v19 = vsub.f32 %v148_v17, %v222_v18 }
 0x11a   :  { %v224_v21 = vand.u32 2147483647, %v223_v19 }
 0x11c   :  { %v232_v22 = vmul.f32 %v250_v20, %v224_v21 }
 0x11e   :  { %v233_v23 = vsel %vm74_vm1, %v232_v22, 0.0 }
 0x11f   :  { %234 = vadd.xlane.f32.xlu0 %v233_v23 }
 0x1ac   :  { %v235_v25 = vpop.xlane.xlu0 %234 }
 0x1ad   :  { %v238_v26 = vadd.f32 %v237_v24, %v235_v25 }
 0x1af   :  { %240 = vst.msk [vmem:[%s473_s6] sm:$0xff] %vm239_vm2, %v238_v26 }
 0x1b0   :  { %245 = vsyncpa [#allocation4], 1 }
 0x1b1   :  { %246 = vsyncpa [#allocation6], 1 }

</bundles_post_ra>
